<compile_context>
chip_gen: v7x
topology: tpu7x:2x2x1
jax: 0.10.0
libtpu: 0.0.40
codegen_flags: <defaults>
</compile_context>

<pallas_src>
import functools

import jax
import jax.numpy as jnp
from jax.experimental import pallas as pl
from jax.experimental.pallas import tpu as pltpu


# ---------------------------------------------------------------------------
# Pass 1: fused QKV projection -> head-major Q, K, V  each (B, H, T, D)
# ---------------------------------------------------------------------------
def _qkv_proj_kernel(x_ref, wq_ref, wk_ref, wv_ref, bq_ref, bk_ref, bv_ref,
                     q_ref, k_ref, v_ref, *, num_heads, head_dim):
    H, D = num_heads, head_dim
    tr = x_ref.shape[0]
    dt = x_ref.dtype
    x = x_ref[...]                                  # (tr, E)

    def project(w_ref, b_ref):
        y = jnp.dot(x, w_ref[...], preferred_element_type=jnp.float32) + b_ref[...]
        # (tr, E) -> (H, tr, D): head-major ONCE, so the flash kernel never
        # pays a per-kv-step relayout.
        return y.reshape(tr, H, D).transpose(1, 0, 2).astype(dt)

    q_ref[...] = project(wq_ref, bq_ref)
    k_ref[...] = project(wk_ref, bk_ref)
    v_ref[...] = project(wv_ref, bv_ref)


# ---------------------------------------------------------------------------
# Pass 2: flash attention over pre-projected head-major Q/K/V, with the
# output projection fused into the last kv step (lane-dense (tq, E) output).
# Grid = (batch, q_tile, kv_tile); kv_tile is the trailing reduction axis.
# ---------------------------------------------------------------------------
def _flash_attn_kernel(q_ref, k_ref, v_ref, wo_ref, bo_ref, out_ref,
                       m_scr, l_scr, acc_scr, *, num_heads, head_dim):
    H, D = num_heads, head_dim
    ki = pl.program_id(2)
    nkv = pl.num_programs(2)
    dt = q_ref.dtype
    tq = q_ref.shape[1]

    @pl.when(ki == 0)
    def _init():
        m_scr[...] = jnp.full(m_scr.shape, -jnp.inf, dtype=m_scr.dtype)
        l_scr[...] = jnp.zeros(l_scr.shape, l_scr.dtype)
        acc_scr[...] = jnp.zeros(acc_scr.shape, acc_scr.dtype)

    q = q_ref[...]                                   # (H, tq, D), resident across ki
    k = k_ref[...]                                   # (H, tkv, D)
    v = v_ref[...]                                   # (H, tkv, D)

    # scores: contract D directly (no transpose), f32 accumulation.
    # Reference applies NO 1/sqrt(D) scaling and NO causal mask.
    s = jnp.einsum('hqd,hkd->hqk', q, k,
                   preferred_element_type=jnp.float32)          # (H, tq, tkv)

    # ---- online softmax (state kept 2-D: no 128-lane padding of (.,.,1)) ----
    m_prev = m_scr[...]                                         # (H, tq)
    m_new = jnp.maximum(m_prev, jnp.max(s, axis=-1))            # (H, tq)
    alpha = jnp.exp(m_prev - m_new)                             # (H, tq)
    p = jnp.exp(s - m_new[:, :, None])                          # (H, tq, tkv)
    l_scr[...] = alpha * l_scr[...] + jnp.sum(p, axis=-1)
    pv = jnp.einsum('hqk,hkd->hqd', p.astype(dt), v,
                    preferred_element_type=jnp.float32)         # (H, tq, D)
    acc_scr[...] = alpha[:, :, None] * acc_scr[...] + pv
    m_scr[...] = m_new

    # ---- last kv step: exact normalization, merge heads, output projection --
    @pl.when(ki == nkv - 1)
    def _finish():
        o = acc_scr[...] / l_scr[...][:, :, None]               # exact divide (fixes
        merged = o.transpose(1, 0, 2).reshape(tq, H * D).astype(dt)  # the approx-rcp bug)
        out = jnp.dot(merged, wo_ref[...],
                      preferred_element_type=jnp.float32) + bo_ref[...]
        out_ref[...] = out.astype(out_ref.dtype)


# ---------------------------------------------------------------------------
# Wrapper
# ---------------------------------------------------------------------------
def _pick_block(total, target):
    """Largest divisor of `total` that is <= target and a multiple of 16,
    falling back to the full extent (always a legal block)."""
    if total <= target:
        return total
    for b in range(min(target, total), 15, -1):
        if total % b == 0 and b % 16 == 0:
            return b
    return total


def _vmem_limit_bytes():
    # ~75% of physical VMEM, capped at 100 MiB: uses v5e/v6e's 128 MiB while
    # staying under v7x's 64 MiB per TensorCore.
    try:
        cap = int(pltpu.get_tpu_info().vmem_capacity_bytes)
    except Exception:
        cap = 64 * 1024 * 1024
    return int(min(100 * 1024 * 1024, (cap * 3) // 4))


def path_multihead_attention(x, wqkv, bqkv, wproj, bproj, *, num_heads,
                             row_block=None, q_block=None, kv_block=None):
    """x: (B, T, E); wqkv: (E, 3E); bqkv: (3E,); wproj: (E, E); bproj: (E,)."""
    B, T, E = x.shape
    assert E % num_heads == 0
    H = num_heads
    D = E // H
    f32 = jnp.float32

    row_block = _pick_block(T, 256) if row_block is None else row_block
    q_block = _pick_block(T, 256) if q_block is None else q_block
    kv_block = _pick_block(T, 256) if kv_block is None else kv_block
    assert T % row_block == 0 and T % q_block == 0 and T % kv_block == 0

    # Split the fused qkv weight in the wrapper (trace-time views; no in-kernel
    # lane slicing needed).
    wq, wk, wv = wqkv[:, :E], wqkv[:, E:2 * E], wqkv[:, 2 * E:]
    bq = bqkv[:E].astype(f32).reshape(1, E)
    bk = bqkv[E:2 * E].astype(f32).reshape(1, E)
    bv = bqkv[2 * E:].astype(f32).reshape(1, E)
    bo = bproj.astype(f32).reshape(1, E)

    itemsize = jnp.dtype(x.dtype).itemsize
    vmem_limit = _vmem_limit_bytes()

    # ------------------------- pass 1: QKV projection ------------------------
    nr = T // row_block
    proj_cost = pl.CostEstimate(
        flops=int(2 * B * T * E * 3 * E),
        transcendentals=0,
        bytes_accessed=int((B * T * E + 3 * E * E + 3 * B * T * E) * itemsize),
    )
    q_hm, k_hm, v_hm = pl.pallas_call(
        functools.partial(_qkv_proj_kernel, num_heads=H, head_dim=D),
        out_shape=tuple(jax.ShapeDtypeStruct((B, H, T, D), x.dtype) for _ in range(3)),
        grid_spec=pltpu.PrefetchScalarGridSpec(
            num_scalar_prefetch=0,
            grid=(B, nr),
            in_specs=[
                pl.BlockSpec((None, row_block, E), lambda b, r: (b, r, 0)),   # x rows
                pl.BlockSpec((E, E), lambda b, r: (0, 0)),                    # Wq
                pl.BlockSpec((E, E), lambda b, r: (0, 0)),                    # Wk
                pl.BlockSpec((E, E), lambda b, r: (0, 0)),                    # Wv
                pl.BlockSpec((1, E), lambda b, r: (0, 0)),                    # bq
                pl.BlockSpec((1, E), lambda b, r: (0, 0)),                    # bk
                pl.BlockSpec((1, E), lambda b, r: (0, 0)),                    # bv
            ],
            out_specs=(
                pl.BlockSpec((None, H, row_block, D), lambda b, r: (b, 0, r, 0)),
                pl.BlockSpec((None, H, row_block, D), lambda b, r: (b, 0, r, 0)),
                pl.BlockSpec((None, H, row_block, D), lambda b, r: (b, 0, r, 0)),
            ),
        ),
        compiler_params=pltpu.CompilerParams(
            dimension_semantics=("parallel", "parallel"),
            vmem_limit_bytes=vmem_limit),
        cost_estimate=proj_cost,
    )(x, wq, wk, wv, bq, bk, bv)

    # ------------------------- pass 2: flash attention -----------------------
    nq, nkv = T // q_block, T // kv_block
    attn_cost = pl.CostEstimate(
        flops=int(4 * B * H * T * T * D + 2 * B * T * E * E),
        transcendentals=int(B * H * T * T),
        bytes_accessed=int((3 * B * T * E + B * T * E + E * E) * itemsize),
    )
    out = pl.pallas_call(
        functools.partial(_flash_attn_kernel, num_heads=H, head_dim=D),
        out_shape=jax.ShapeDtypeStruct((B, T, E), x.dtype),
        grid_spec=pltpu.PrefetchScalarGridSpec(
            num_scalar_prefetch=0,
            grid=(B, nq, nkv),
            in_specs=[
                pl.BlockSpec((None, H, q_block, D), lambda b, qi, ki: (b, 0, qi, 0)),
                pl.BlockSpec((None, H, kv_block, D), lambda b, qi, ki: (b, 0, ki, 0)),
                pl.BlockSpec((None, H, kv_block, D), lambda b, qi, ki: (b, 0, ki, 0)),
                pl.BlockSpec((E, E), lambda b, qi, ki: (0, 0)),               # Wproj
                pl.BlockSpec((1, E), lambda b, qi, ki: (0, 0)),               # bproj
            ],
            out_specs=pl.BlockSpec((None, q_block, E), lambda b, qi, ki: (b, qi, 0)),
            scratch_shapes=[
                pltpu.VMEM((H, q_block), jnp.float32),       # running max (2-D)
                pltpu.VMEM((H, q_block), jnp.float32),       # running sum (2-D)
                pltpu.VMEM((H, q_block, D), jnp.float32),    # output accumulator
            ],
        ),
        compiler_params=pltpu.CompilerParams(
            dimension_semantics=("parallel", "parallel", "arbitrary"),
            vmem_limit_bytes=vmem_limit),
        cost_estimate=attn_cost,
    )(q_hm, k_hm, v_hm, wproj, bo)
    return out


def _reference(x, wqkv, bqkv, wproj, bproj, num_heads):
    """Pure-JAX transcription of the PyTorch forward (rel=None path)."""
    B, T, E = x.shape
    H, D = num_heads, E // num_heads
    qkv = jnp.einsum('bte,ef->btf', x, wqkv) + bqkv
    q, k, v = jnp.split(qkv, 3, axis=-1)
    q = q.reshape(B, T, H, D).transpose(0, 2, 1, 3)          # (B,H,T,D)
    k = k.reshape(B, T, H, D).transpose(0, 2, 3, 1)          # (B,H,D,T)
    v = v.reshape(B, T, H, D).transpose(0, 2, 1, 3)          # (B,H,T,D)
    w = jnp.einsum('bhtd,bhds->bhts', q, k)                  # no scale, no mask
    w = jax.nn.softmax(w, axis=-1)
    a = jnp.einsum('bhts,bhsd->bhtd', w, v)
    a = a.transpose(0, 2, 1, 3).reshape(B, T, E)
    return jnp.einsum('bte,ef->btf', a, wproj) + bproj


if __name__ == "__main__":
    key = jax.random.PRNGKey(0)

    def make_inputs(k, B, T, E):
        kx, k1, k2, k3, k4 = jax.random.split(k, 5)
        x = jax.random.normal(kx, (B, T, E), dtype=jnp.float32)
        wqkv = jax.random.normal(k1, (E, 3 * E), dtype=jnp.float32) / jnp.sqrt(E)
        bqkv = jax.random.normal(k2, (3 * E,), dtype=jnp.float32) * 0.02
        wproj = jax.random.normal(k3, (E, E), dtype=jnp.float32) / jnp.sqrt(E)
        bproj = jax.random.normal(k4, (E,), dtype=jnp.float32) * 0.02
        return x, wqkv, bqkv, wproj, bproj

    # --- small shapes consistent with the module: B=2, T=8, E=32, H=4 --------
    B, T, E, H = 2, 8, 32, 4
    k0, k1 = jax.random.split(key)
    x, wqkv, bqkv, wproj, bproj = make_inputs(k0, B, T, E)
    ref = _reference(x, wqkv, bqkv, wproj, bproj, H)

    out = path_multihead_attention(x, wqkv, bqkv, wproj, bproj, num_heads=H)
    out = jax.block_until_ready(out)
    assert out.shape == (B, T, E)
    assert jnp.allclose(out, ref, atol=2e-3, rtol=2e-3), (
        f"f32 mismatch vs reference (max abs err {float(jnp.max(jnp.abs(out - ref)))})")

    # --- multi-tile grid path (exercises the online-softmax kv streaming) ----
    x2, wqkv2, bqkv2, wproj2, bproj2 = make_inputs(k1, 2, 32, 32)
    ref2 = _reference(x2, wqkv2, bqkv2, wproj2, bproj2, H)
    out2 = path_multihead_attention(x2, wqkv2, bqkv2, wproj2, bproj2,
                                    num_heads=H, row_block=16, q_block=16, kv_block=8)
    out2 = jax.block_until_ready(out2)
    assert jnp.allclose(out2, ref2, atol=2e-3, rtol=2e-3), (
        f"f32 multi-tile mismatch (max abs err {float(jnp.max(jnp.abs(out2 - ref2)))})")

    # --- bf16 path: bf16 MXU operands, f32 accumulation (loose tolerance) ----
    out_bf16 = path_multihead_attention(
        x.astype(jnp.bfloat16), wqkv.astype(jnp.bfloat16), bqkv,
        wproj.astype(jnp.bfloat16), bproj, num_heads=H)
    out_bf16 = jax.block_until_ready(out_bf16)
    diff = jnp.abs(out_bf16.astype(jnp.float32) - ref)
    assert float(jnp.max(diff)) < 0.5 and float(jnp.mean(diff)) < 0.1, \
        "bf16 path deviates too much from reference"

    print("KERNEL_OK")
</pallas_src>

<mosaic_0001>
module attributes {stable_mosaic.version = 11 : i64} {
  func.func @_qkv_proj_kernel(%arg0: i32, %arg1: i32, %arg2: memref<1x8x32xf32, #tpu.memory_space<vmem>>, %arg3: memref<32x32xf32, #tpu.memory_space<vmem>>, %arg4: memref<32x32xf32, #tpu.memory_space<vmem>>, %arg5: memref<32x32xf32, #tpu.memory_space<vmem>>, %arg6: memref<1x32xf32, #tpu.memory_space<vmem>>, %arg7: memref<1x32xf32, #tpu.memory_space<vmem>>, %arg8: memref<1x32xf32, #tpu.memory_space<vmem>>, %arg9: memref<1x4x8x8xf32, #tpu.memory_space<vmem>>, %arg10: memref<1x4x8x8xf32, #tpu.memory_space<vmem>>, %arg11: memref<1x4x8x8xf32, #tpu.memory_space<vmem>>) attributes {dimension_semantics = [#tpu.dimension_semantics<parallel>, #tpu.dimension_semantics<parallel>], iteration_bounds = array<i64: 2, 1>, scalar_prefetch = 0 : i64, scratch_operands = 0 : i64, tpu.core_type = #tpu.core_type<tc>, window_params = [{transform_indices = @transform_0, window_bounds = array<i64: 1, 8, 32>}, {pipeline_mode = #tpu.pipeline_mode<synchronous>, transform_indices = @transform_1, window_bounds = array<i64: 32, 32>}, {pipeline_mode = #tpu.pipeline_mode<synchronous>, transform_indices = @transform_2, window_bounds = array<i64: 32, 32>}, {pipeline_mode = #tpu.pipeline_mode<synchronous>, transform_indices = @transform_3, window_bounds = array<i64: 32, 32>}, {pipeline_mode = #tpu.pipeline_mode<synchronous>, transform_indices = @transform_4, window_bounds = array<i64: 1, 32>}, {pipeline_mode = #tpu.pipeline_mode<synchronous>, transform_indices = @transform_5, window_bounds = array<i64: 1, 32>}, {pipeline_mode = #tpu.pipeline_mode<synchronous>, transform_indices = @transform_6, window_bounds = array<i64: 1, 32>}, {transform_indices = @transform_7, window_bounds = array<i64: 1, 4, 8, 8>}, {transform_indices = @transform_8, window_bounds = array<i64: 1, 4, 8, 8>}, {transform_indices = @transform_9, window_bounds = array<i64: 1, 4, 8, 8>}]} {
    %c0 = arith.constant 0 : index
    %c0_0 = arith.constant 0 : index
    %c0_1 = arith.constant 0 : index
    %0 = vector.load %arg2[%c0, %c0_0, %c0_1] : memref<1x8x32xf32, #tpu.memory_space<vmem>>, vector<1x8x32xf32>
    %1 = vector.shape_cast %0 : vector<1x8x32xf32> to vector<8x32xf32>
    %c0_2 = arith.constant 0 : index
    %c0_3 = arith.constant 0 : index
    %2 = vector.load %arg3[%c0_2, %c0_3] : memref<32x32xf32, #tpu.memory_space<vmem>>, vector<32x32xf32>
    %cst = arith.constant dense<0.000000e+00> : vector<8x32xf32>
    %3 = tpu.matmul %1, %2, %cst {dimension_numbers = #tpu.dot_dimension_numbers<[1], [0], [0], [1], [0, 0, 1, 1], [], []>} : vector<8x32xf32>, vector<32x32xf32>, vector<8x32xf32> -> vector<8x32xf32>
    %c0_4 = arith.constant 0 : index
    %c0_5 = arith.constant 0 : index
    %4 = vector.load %arg6[%c0_4, %c0_5] : memref<1x32xf32, #tpu.memory_space<vmem>>, vector<1x32xf32>
    %5 = vector.broadcast %4 : vector<1x32xf32> to vector<8x32xf32>
    %6 = arith.addf %3, %5 : vector<8x32xf32>
    %7 = vector.shape_cast %6 : vector<8x32xf32> to vector<8x4x8xf32>
    %8 = tpu.transpose %7, [1, 0, 2] : vector<8x4x8xf32> -> vector<4x8x8xf32>
    %c0_6 = arith.constant 0 : index
    %c0_7 = arith.constant 0 : index
    %c0_8 = arith.constant 0 : index
    %c0_9 = arith.constant 0 : index
    %9 = vector.load %arg9[%c0_6, %c0_7, %c0_8, %c0_9] : memref<1x4x8x8xf32, #tpu.memory_space<vmem>>, vector<1x4x8x8xf32>
    %10 = vector.shape_cast %9 : vector<1x4x8x8xf32> to vector<4x8x8xf32>
    %11 = vector.shape_cast %8 : vector<4x8x8xf32> to vector<1x4x8x8xf32>
    tpu.vector_store %arg9[%c0_6, %c0_7, %c0_8, %c0_9], %11 {strides = array<i32>} : memref<1x4x8x8xf32, #tpu.memory_space<vmem>>, vector<1x4x8x8xf32>,
    %c0_10 = arith.constant 0 : index
    %c0_11 = arith.constant 0 : index
    %12 = vector.load %arg4[%c0_10, %c0_11] : memref<32x32xf32, #tpu.memory_space<vmem>>, vector<32x32xf32>
    %cst_12 = arith.constant dense<0.000000e+00> : vector<8x32xf32>
    %13 = tpu.matmul %1, %12, %cst_12 {dimension_numbers = #tpu.dot_dimension_numbers<[1], [0], [0], [1], [0, 0, 1, 1], [], []>} : vector<8x32xf32>, vector<32x32xf32>, vector<8x32xf32> -> vector<8x32xf32>
    %c0_13 = arith.constant 0 : index
    %c0_14 = arith.constant 0 : index
    %14 = vector.load %arg7[%c0_13, %c0_14] : memref<1x32xf32, #tpu.memory_space<vmem>>, vector<1x32xf32>
    %15 = vector.broadcast %14 : vector<1x32xf32> to vector<8x32xf32>
    %16 = arith.addf %13, %15 : vector<8x32xf32>
    %17 = vector.shape_cast %16 : vector<8x32xf32> to vector<8x4x8xf32>
    %18 = tpu.transpose %17, [1, 0, 2] : vector<8x4x8xf32> -> vector<4x8x8xf32>
    %c0_15 = arith.constant 0 : index
    %c0_16 = arith.constant 0 : index
    %c0_17 = arith.constant 0 : index
    %c0_18 = arith.constant 0 : index
    %19 = vector.load %arg10[%c0_15, %c0_16, %c0_17, %c0_18] : memref<1x4x8x8xf32, #tpu.memory_space<vmem>>, vector<1x4x8x8xf32>
    %20 = vector.shape_cast %19 : vector<1x4x8x8xf32> to vector<4x8x8xf32>
    %21 = vector.shape_cast %18 : vector<4x8x8xf32> to vector<1x4x8x8xf32>
    tpu.vector_store %arg10[%c0_15, %c0_16, %c0_17, %c0_18], %21 {strides = array<i32>} : memref<1x4x8x8xf32, #tpu.memory_space<vmem>>, vector<1x4x8x8xf32>,
    %c0_19 = arith.constant 0 : index
    %c0_20 = arith.constant 0 : index
    %22 = vector.load %arg5[%c0_19, %c0_20] : memref<32x32xf32, #tpu.memory_space<vmem>>, vector<32x32xf32>
    %cst_21 = arith.constant dense<0.000000e+00> : vector<8x32xf32>
    %23 = tpu.matmul %1, %22, %cst_21 {dimension_numbers = #tpu.dot_dimension_numbers<[1], [0], [0], [1], [0, 0, 1, 1], [], []>} : vector<8x32xf32>, vector<32x32xf32>, vector<8x32xf32> -> vector<8x32xf32>
    %c0_22 = arith.constant 0 : index
    %c0_23 = arith.constant 0 : index
    %24 = vector.load %arg8[%c0_22, %c0_23] : memref<1x32xf32, #tpu.memory_space<vmem>>, vector<1x32xf32>
    %25 = vector.broadcast %24 : vector<1x32xf32> to vector<8x32xf32>
    %26 = arith.addf %23, %25 : vector<8x32xf32>
    %27 = vector.shape_cast %26 : vector<8x32xf32> to vector<8x4x8xf32>
    %28 = tpu.transpose %27, [1, 0, 2] : vector<8x4x8xf32> -> vector<4x8x8xf32>
    %c0_24 = arith.constant 0 : index
    %c0_25 = arith.constant 0 : index
    %c0_26 = arith.constant 0 : index
    %c0_27 = arith.constant 0 : index
    %29 = vector.load %arg11[%c0_24, %c0_25, %c0_26, %c0_27] : memref<1x4x8x8xf32, #tpu.memory_space<vmem>>, vector<1x4x8x8xf32>
    %30 = vector.shape_cast %29 : vector<1x4x8x8xf32> to vector<4x8x8xf32>
    %31 = vector.shape_cast %28 : vector<4x8x8xf32> to vector<1x4x8x8xf32>
    tpu.vector_store %arg11[%c0_24, %c0_25, %c0_26, %c0_27], %31 {strides = array<i32>} : memref<1x4x8x8xf32, #tpu.memory_space<vmem>>, vector<1x4x8x8xf32>,
    return
  }
  func.func @transform_0(%arg0: i32, %arg1: i32) -> (i32, i32, i32) {
    %c0_i32 = arith.constant 0 : i32
    %c0_i32_0 = arith.constant 0 : i32
    return %arg0, %arg1, %c0_i32 : i32, i32, i32
  }
  func.func @transform_1(%arg0: i32, %arg1: i32) -> (i32, i32) {
    %c0_i32 = arith.constant 0 : i32
    %c0_i32_0 = arith.constant 0 : i32
    %c0_i32_1 = arith.constant 0 : i32
    return %c0_i32, %c0_i32_0 : i32, i32
  }
  func.func @transform_2(%arg0: i32, %arg1: i32) -> (i32, i32) {
    %c0_i32 = arith.constant 0 : i32
    %c0_i32_0 = arith.constant 0 : i32
    %c0_i32_1 = arith.constant 0 : i32
    return %c0_i32, %c0_i32_0 : i32, i32
  }
  func.func @transform_3(%arg0: i32, %arg1: i32) -> (i32, i32) {
    %c0_i32 = arith.constant 0 : i32
    %c0_i32_0 = arith.constant 0 : i32
    %c0_i32_1 = arith.constant 0 : i32
    return %c0_i32, %c0_i32_0 : i32, i32
  }
  func.func @transform_4(%arg0: i32, %arg1: i32) -> (i32, i32) {
    %c0_i32 = arith.constant 0 : i32
    %c0_i32_0 = arith.constant 0 : i32
    %c0_i32_1 = arith.constant 0 : i32
    return %c0_i32, %c0_i32_0 : i32, i32
  }
  func.func @transform_5(%arg0: i32, %arg1: i32) -> (i32, i32) {
    %c0_i32 = arith.constant 0 : i32
    %c0_i32_0 = arith.constant 0 : i32
    %c0_i32_1 = arith.constant 0 : i32
    return %c0_i32, %c0_i32_0 : i32, i32
  }
  func.func @transform_6(%arg0: i32, %arg1: i32) -> (i32, i32) {
    %c0_i32 = arith.constant 0 : i32
    %c0_i32_0 = arith.constant 0 : i32
    %c0_i32_1 = arith.constant 0 : i32
    return %c0_i32, %c0_i32_0 : i32, i32
  }
  func.func @transform_7(%arg0: i32, %arg1: i32) -> (i32, i32, i32, i32) {
    %c0_i32 = arith.constant 0 : i32
    %c0_i32_0 = arith.constant 0 : i32
    %c0_i32_1 = arith.constant 0 : i32
    return %arg0, %c0_i32, %arg1, %c0_i32_0 : i32, i32, i32, i32
  }
  func.func @transform_8(%arg0: i32, %arg1: i32) -> (i32, i32, i32, i32) {
    %c0_i32 = arith.constant 0 : i32
    %c0_i32_0 = arith.constant 0 : i32
    %c0_i32_1 = arith.constant 0 : i32
    return %arg0, %c0_i32, %arg1, %c0_i32_0 : i32, i32, i32, i32
  }
  func.func @transform_9(%arg0: i32, %arg1: i32) -> (i32, i32, i32, i32) {
    %c0_i32 = arith.constant 0 : i32
    %c0_i32_0 = arith.constant 0 : i32
    %c0_i32_1 = arith.constant 0 : i32
    return %arg0, %c0_i32, %arg1, %c0_i32_0 : i32, i32, i32, i32
  }
}

</mosaic_0001>

<bundles_post_ra>
// kernel: tpu_custom_call.1
= control target key start
LH: loop header
LB: loop body
LE: loop exit
PB: predicated region body
PF: predicated region fallthrough
CT: control target
= control target key end

     0   :  { %s2394_s0 = inlined_call_operand.hbm [shape: f32[2,8,32], index: 0, kind: input, shape index: {}]   ;;  %s2395_s1 = inlined_call_operand.hbm [shape: f32[32,32], index: 1, kind: input, shape index: {}]   ;;  %s2396_s2 = inlined_call_operand.hbm [shape: f32[32,32], index: 2, kind: input, shape index: {}]   ;;  %s2397_s3 = inlined_call_operand.hbm [shape: f32[32,32], index: 3, kind: input, shape index: {}]   ;;  %s2398_s4 = inlined_call_operand.vmem [shape: f32[1,32], index: 4, kind: input, shape index: {}]   ;;  %s2399_s5 = inlined_call_operand.vmem [shape: f32[1,32], index: 5, kind: input, shape index: {}]   ;;  %s2400_s6 = inlined_call_operand.vmem [shape: f32[1,32], index: 6, kind: input, shape index: {}]   ;;  %s2401_s7 = inlined_call_operand.hbm [shape: f32[2,4,8,8], index: 7, kind: output, shape index: {0}]   ;;  %s2402_s8 = inlined_call_operand.hbm [shape: f32[2,4,8,8], index: 8, kind: output, shape index: {1}]   ;;  %s2403_s9 = inlined_call_operand.hbm [shape: f32[2,4,8,8], index: 9, kind: output, shape index: {2}]  }
   0x1   :  { %2415 = sst [smem:[#allocation21_spill]] %s2401_s7 }
   0x2   :  { %2416 = sst [smem:[#allocation22_spill]] %s2402_s8 }
   0x3   :  { %2417 = sst [smem:[#allocation23_spill]] %s2403_s9 }
   0x4   :  { %15 = vsyncpa [#allocation3], 0 }
   0x5   :  { %17 = vsyncpa [#allocation3 + $0x1], 0 }
   0x6   :  { %18 = vsyncpa [#allocation6], 0 }
   0x7   :  { %19 = vsyncpa [#allocation9], 0 }
   0x8   :  { %20 = vsyncpa [#allocation4], 0 }
   0x9   :  { %22 = vsyncpa [#allocation4 + $0x1], 0 }
   0xa   :  { %23 = vsyncpa [#allocation12], 0 }
   0xb   :  { %25 = vsyncpa [#allocation12 + $0x1], 0  ;;  %s1926_s30 = smov 0   ;;  %s1928_s10 = smov 0  }
   0xc   :  { %s1930_s11 = smov 0   ;;  %s1932_s12 = smov 0  }
   0xd   :  { %s1934_s13 = smov 0   ;;  %s1936_s14 = smov 0  }
   0xe LB: > { %2418 = sst [smem:[#allocation19_spill]] %s1835_s30  ;;  %s1957_s15 = sadd.s32 4294967295, %s1855_s14   ;;  %s1855_s14 = sphi %s1936_s14, %s31_s14   ;;  %s1851_s13 = sphi %s1934_s13, %s2449_s13   ;;  %s1847_s12 = sphi %s1932_s12, %s2448_s12   ;;  %s1843_s11 = sphi %s1930_s11, %s2447_s11   ;;  %s1839_s10 = sphi %s1928_s10, %s2446_s10   ;;  %s1835_s30 = sphi %s1926_s30, %s2445_s30  }
   0xf   : > { %s2404_s16 = sadd.s32 4294967294, %s1855_s14   ;;  %p65_p0 = scmp.ne.s32.totalorder %s1839_s10, %s1835_s30 }
  0x10   : > { %p2406_p1 = scmp.eq.s32.totalorder %s1957_s15, 0  ;;  %p223_p3 = scmp.eq.s32.totalorder %s2404_s16, 1 }
  0x11   : > { %p1369_p5 = scmp.ge.s32.totalorder %s1855_s14, 1  ;;  %p286_p7 = scmp.lt.s32.totalorder %s1855_s14, 3 }
  0x12   : > { %p1968_p4 = por %p2406_p1, %p65_p0  ;;  %p1973_p6 = por %p223_p3, %p65_p0 }
  0x13   : > { %p1978_p8 = pnand %p1369_p5, %p286_p7  ;;  %s1857_s20 = smov [#allocation5]  }
  0x14   : > { %s2419_s17 = scalar_select %p1968_p4, 1, 0 }
  0x15   : > { %s2420_s18 = scalar_select %p1973_p6, 1, 0 }
  0x16   : > { %s2422_s19 = scalar_select %p1978_p8, 1, 0 }
  0x17   : > { %2421 = sst [smem:[#allocation20_spill]] %s2420_s18  ;;  %s298_s21 = sshll.u32 %s1857_s20, 4  ;;  %s1982_s21 = int_to_ptr.vmem [resolvable:$true] %s298_s21 }
  0x18   : > { %p1496_p9 = pneg %p1978_p8  ;;  %s1858_s23 = smov [#allocation7]  }
  0x19   : > { %s311_s24 = sshll.u32 %s1858_s23, 4  ;;  %s1859_s25 = smov [#allocation8]   ;;  %s1993_s24 = int_to_ptr.vmem [resolvable:$true] %s311_s24 }
  0x1a   : > { %p1989_p11 = pnand %p1496_p9, %p2406_p1  ;;  %s1995_s26 = sshll.u32 %s1859_s25, 4  ;;  %s325_s26 = int_to_ptr.vmem [resolvable:$true] %s1995_s26 }
  0x1b   : > { %s1591_s29 = scalar_lea.hbm %s2395_s1, 512 }
  0x1c   : > { %p1592_p12 = scmp.ne.s32.totalorder %s2395_s1, %s1591_s29  ;;  %p2005_p13 = pneg %p1989_p11 }
  0x1d   : > { %p1598_p5 = scmp.lt.u32.totalorder %s1591_s29, %s2395_s1 }
  0x1e   : > { %p1594_p0 = pnand %p2005_p13, %p1592_p12 }
  0x20   : > { %p1595_p3 = pneg %p1594_p0 }
  0x22   : > { %p1600_p7 = pnand %p1598_p5, %p1595_p3 }
  0x24   : > { %1603 = shalt.err (!%p1600_p7)
}
  0x25   : > { %s1604_s16 = scalar_lea.vmem %s1982_s21, 512  ;;  %p1612_p2 = scmp.lt.s32.totalorder %s1982_s21, %s1982_s21 }
  0x26   : > { %p1605_p9 = scmp.ne.s32.totalorder %s1982_s21, %s1604_s16  ;;  %p1613_p6 = scmp.lt.s32.totalorder %s1604_s16, %s1604_s16 }
  0x28   : > { %p1607_p10 = pnand %p1605_p9, %p2005_p13  ;;  %p1614_p12 = por %p1613_p6, %p1612_p2 }
  0x2a   : > { %p1608_p1 = pneg %p1607_p10 }
  0x2c   : > { %p1615_p0 = pnand %p1614_p12, %p1608_p1 }
  0x2e   : > { %1618 = shalt.err (!%p1615_p0)
}
  0x2f   : > { %s1860_s27 = smov 128   ;;  %s1861_s28 = smov 8  }
  0x30   : > { %1499 = dma.hbm_to_vmem [thread:$0]  (!%p1989_p11), %s2395_s1, 512, %s1982_s21, [#allocation6], %s1860_s27, %s1860_s27, %s1861_s28  }
  0x31   : > { %s1619_s16 = scalar_lea.hbm %s2396_s2, 512 }
  0x32   : > { %p1620_p1 = scmp.ne.s32.totalorder %s2396_s2, %s1619_s16  ;;  %p1626_p10 = scmp.lt.u32.totalorder %s1619_s16, %s2396_s2 }
  0x34   : > { %p1622_p2 = pnand %p1620_p1, %p2005_p13 }
  0x36   : > { %p1623_p6 = pneg %p1622_p2 }
  0x38   : > { %p1628_p3 = pnand %p1626_p10, %p1623_p6 }
  0x3a   : > { %1631 = shalt.err (!%p1628_p3)
}
  0x3b   : > { %s1632_s21 = scalar_lea.vmem %s1993_s24, 512  ;;  %p1640_p12 = scmp.lt.s32.totalorder %s1993_s24, %s1993_s24 }
  0x3c   : > { %p1633_p5 = scmp.ne.s32.totalorder %s1993_s24, %s1632_s21  ;;  %p1641_p0 = scmp.lt.s32.totalorder %s1632_s21, %s1632_s21 }
  0x3e   : > { %p1635_p7 = pnand %p1633_p5, %p2005_p13  ;;  %p1642_p1 = por %p1641_p0, %p1640_p12 }
  0x40   : > { %p1636_p9 = pneg %p1635_p7 }
  0x42   : > { %p1643_p2 = pnand %p1642_p1, %p1636_p9 }
  0x44   : > { %1646 = shalt.err (!%p1643_p2)
}
  0x45   : > { %1502 = dma.hbm_to_vmem [thread:$0]  (!%p1989_p11), %s2396_s2, 512, %s1993_s24, [#allocation6], %s1860_s27, %s1860_s27, %s1861_s28  }
  0x46   : > { %s1647_s29 = scalar_lea.hbm %s2397_s3, 512 }
  0x47   : > { %p1648_p6 = scmp.ne.s32.totalorder %s2397_s3, %s1647_s29  ;;  %p1654_p5 = scmp.lt.u32.totalorder %s1647_s29, %s2397_s3 }
  0x49   : > { %p1650_p10 = pnand %p1648_p6, %p2005_p13 }
  0x4b   : > { %p1651_p3 = pneg %p1650_p10 }
  0x4d   : > { %p1656_p7 = pnand %p1654_p5, %p1651_p3 }
  0x4f   : > { %1659 = shalt.err (!%p1656_p7)
}
  0x50   : > { %s1660_s21 = scalar_lea.vmem %s325_s26, 512  ;;  %p1668_p1 = scmp.lt.s32.totalorder %s325_s26, %s325_s26 }
  0x51   : > { %p1661_p9 = scmp.ne.s32.totalorder %s325_s26, %s1660_s21  ;;  %p1669_p2 = scmp.lt.s32.totalorder %s1660_s21, %s1660_s21 }
  0x53   : > { %p1663_p12 = pnand %p1661_p9, %p2005_p13  ;;  %p1670_p4 = por %p1669_p2, %p1668_p1 }
  0x55   : > { %p1664_p0 = pneg %p1663_p12 }
  0x57   : > { %p1671_p8 = pnand %p1670_p4, %p1664_p0 }
  0x59   : > { %1674 = shalt.err (!%p1671_p8)
}
  0x5a   : > { %1505 = dma.hbm_to_vmem [thread:$0]  (!%p1989_p11), %s2397_s3, 512, %s325_s26, [#allocation9], %s1860_s27, %s1860_s27, %s1861_s28  }
  0x5b   : > { %s52_s18 = sadd.s32 1, %s1843_s11  ;;  %s43_s22 = sadd.s32 1, %s1851_s13 }
  0x5c   : > { %p59_p4 = scmp.ne.s32.totalorder %s1843_s11, %s1839_s10  ;;  %p45_p8 = scmp.ge.s32.totalorder %s43_s22, 2 }
  0x5d   : > { %p60_p13 = scmp.eq.s32.totalorder %s1855_s14, 0  ;;  %p2425_p6 = scmp.eq.s32.totalorder %s1957_s15, 1 }
  0x5e   : > { %p1523_p3 = scmp.lt.s32.totalorder %s1855_s14, 2  ;;  %s2451_s22 = smov (%p45_p8, %s43_s22), 0 }
  0x5f   : > { %p2084_p10 = por %p2425_p6, %p59_p4  ;;  %p61_p5 = por %p60_p13, %p59_p4 }
  0x60   : > { %s347_s9 = sand.u32 1, %s1843_s11   ;;  %s47_s30 = ssub.s32 %s1851_s13, %s2451_s22 }
  0x61   : > { %p50_p7 = scmp.eq.s32.totalorder %s47_s30, 0  ;;  %s1374_s26 = sshll.u32 %s347_s9, 3 }
  0x62   : > { %s1375_s27 = sshll.u32 %s1851_s13, 7  ;;  %s351_s25 = scalar_lea.vmem [#allocation2], %s1374_s26 }
  0x63   : > { %s2096_s28 = scalar_select %p50_p7, %s1843_s11, %s52_s18  }
  0x64   : > { %s2101_s23 = scalar_lea.hbm %s2394_s0, %s1375_s27  ;;  %s359_s16 = sshll.u32 %s351_s25, 4  ;;  %s2103_s16 = int_to_ptr.vmem [resolvable:$true] %s359_s16 }
  0x65   : > { %p2107_p11 = pnand %p1523_p3, %p61_p5  ;;  %s348_s24 = scalar_lea.sflag [#allocation3], %s347_s9 }
  0x66   : > { %s1675_s7 = scalar_lea.hbm %s2101_s23, 128  ;;  %s1680_s26 = scalar_lea.hbm %s2394_s0, 256 }
  0x67   : > { %p1676_p9 = scmp.ne.s32.totalorder %s2101_s23, %s1675_s7  ;;  %p1677_p12 = pneg %p2107_p11 }
  0x68   : > { %p1681_p2 = scmp.lt.u32.totalorder %s2101_s23, %s2394_s0  ;;  %p1682_p4 = scmp.lt.u32.totalorder %s1680_s26, %s1675_s7 }
  0x69   : > { %p1678_p0 = pnand %p1677_p12, %p1676_p9  ;;  %p1684_p13 = scmp.lt.u32.totalorder %s1675_s7, %s2101_s23 }
  0x6a   : > { %p1683_p8 = por %p1682_p4, %p1681_p2 }
  0x6b   : > { %p1679_p1 = pneg %p1678_p0 }
  0x6c   : > { %p1685_p6 = por %p1684_p13, %p1683_p8 }
  0x6e   : > { %p1686_p3 = pnand %p1685_p6, %p1679_p1 }
  0x70   : > { %1689 = shalt.err (!%p1686_p3)
}
  0x71   : > { %s1690_s9 = scalar_lea.vmem %s2103_s16, 128  ;;  %s1862_s20 = smov [#allocation2]  }
  0x72   : > { %p1691_p5 = scmp.ne.s32.totalorder %s2103_s16, %s1690_s9  ;;  %s1695_s25 = sshll.u32 %s1862_s20, 4  ;;  %s1696_s25 = int_to_ptr.vmem [resolvable:$false] %s1695_s25 }
  0x73   : > { %s1697_s18 = scalar_lea.vmem %s1696_s25, 256  ;;  %p1698_p0 = scmp.lt.s32.totalorder %s2103_s16, %s1696_s25 }
  0x74   : > { %p1693_p7 = pnand %p1691_p5, %p1677_p12  ;;  %p1699_p2 = scmp.lt.s32.totalorder %s1697_s18, %s1690_s9 }
  0x76   : > { %p1694_p9 = pneg %p1693_p7  ;;  %p1700_p4 = por %p1699_p2, %p1698_p0 }
  0x78   : > { %p1701_p8 = pnand %p1700_p4, %p1694_p9 }
  0x7a   : > { %1704 = shalt.err (!%p1701_p8)
}
  0x7b   : > { %1509 = dma.hbm_to_vmem [thread:$0]  (!%p2107_p11), %s2101_s23, 128, %s2103_s16, %s348_s24  }
  0x7c   : > { %p2428_p1 = scmp.ne.s32.totalorder %s2422_s19, 0 }
  0x7d   : > { %s2139_s7 = sand.u32 (!%p2428_p1), 1, %s1839_s10   ;;  %p2429_p12 = scmp.ne.s32.totalorder (!%p2428_p1), %s2419_s17, 0 }
  0x7e   : > { %368 = sbr.rel (%p2428_p1) target bundleno = 577 (0x241), region = 48  ;;  %s1377_s30 = sshll.u32 (!%p2428_p1), %s2139_s7, 3 }
  0x7f   : > { %s371_s26 = scalar_lea.sflag (!%p2428_p1), [#allocation3], %s2139_s7  ;;  %s2143_s27 = scalar_lea.vmem (!%p2428_p1), [#allocation2], %s1377_s30 }
  0x85   : > { %1814 = dma.done.wait (%p2429_p12), %s371_s26, 128  }
  0x86   : > { %1816 = vsyncadd (%p2429_p12), %s371_s26, 4294967168  ;;  %p2430_p11 = scmp.eq.s32.totalorder %s1957_s15, 0 }
  0x88   : > { %1818 = dma.done.wait (%p2430_p11), [#allocation6], 1024   ;;  %p2431_p13 = pmov %p2430_p11 }
  0x89   : > { %p2432_p6 = pmov %p2430_p11 }
  0x8a   : > { %1820 = vsyncadd (%p2431_p13), [#allocation6], 4294966272 }
  0x8b   : > { %1822 = dma.done.wait (%p2432_p6), [#allocation9], 512   ;;  %p2433_p3 = pmov %p2432_p6 }
  0x8c   : > { %v1863_v0 = vmov 0.0|0.0   ;;  %vm1864_vm0 = vmmov 0   ;;  %v1865_v1 = vmov 0.0   ;;  %v668_v2 = vld [vmem:[#allocation7] sm:$0xff]  ;;  %v669_v3 = vld [vmem:[#allocation7 + $0x8] sm:$0xff]  ;;  %v670_v7 = vld [vmem:[#allocation7 + $0x10] sm:$0xff]  ;;  %v532_v35 = vlaneseq }
  0x8d   : > { %1824 = vsyncadd (%p2433_p3), [#allocation9], 4294966784  ;;  %1464 = vmatprep.subr.bf16.mxu1 %v1863_v0  ;;  %1458 = vmatprep.subr.bf16.mxu0 %v1863_v0  ;;  %v432_v4 = vld [vmem:[#allocation5] sm:$0xff]  ;;  %v1465_v5 = vpack.c.bf16 %v669_v3, %v668_v2  ;;  %v433_v6 = vld [vmem:[#allocation5 + $0x8] sm:$0xff]  ;;  %vm443_vm1 = vcmask 261120   ;;  %s1866_s21 = smov 104  }
  0x8e   : > { %1444 = vmatprep.mubr.msk.f32.mxu1 %vm1864_vm0, %v1865_v1  ;;  %1433 = vmatprep.mubr.msk.f32.mxu0 %vm1864_vm0, %v1865_v1  ;;  %v671_v8 = vld [vmem:[#allocation7 + $0x18] sm:$0xff]  ;;  %v1459_v9 = vpack.c.bf16 %v433_v6, %v432_v4  ;;  %v434_v10 = vld [vmem:[#allocation5 + $0x10] sm:$0xff]  ;;  %v899_v14 = vld [vmem:[#allocation8] sm:$0xff]  ;;  %s1867_s24 = smov 120   ;;  %s1868_s29 = smov 112   ;;  %v533_v39 = vshrl.u32 %v532_v35, 7 }
  0x8f   : > { %v435_v11 = vld [vmem:[#allocation5 + $0x18] sm:$0xff]  ;;  %1466 = vmatpush3.bf16.msra.mxu1 %v1465_v5  ;;  %v1468_v12 = vpack.c.bf16 %v671_v8, %v670_v7  ;;  %v900_v15 = vld [vmem:[#allocation8 + $0x8] sm:$0xff]  ;;  %v901_v18 = vld [vmem:[#allocation8 + $0x10] sm:$0xff]  ;;  %v1869_v33 = vmov 1983009808   ;;  %vm663_vm2 = vcmask 64512  }
  0x90   : > { %1460 = vmatpush3.bf16.msra.mxu0 %v1459_v9  ;;  %1467 = vmatprep.subr.bf16.mxu1 %v1863_v0  ;;  %v1462_v13 = vpack.c.bf16 %v435_v11, %v434_v10  ;;  %v431_v16 = vld [vmem:[%s2143_s27] sm:$0xff]  ;;  %v1471_v17 = vpack.c.bf16 %v900_v15, %v899_v14  ;;  %v530_v34 = vunpack.c.l.s4 %v1869_v33  ;;  %v1870_v36 = vmov 1934713408   ;;  %s2194_s25 = sshll.u32 %s2139_s7, 5  ;;  %s1135_s18 = sand.u32 1, %s1957_s15  }
  0x91   : > { %1461 = vmatprep.subr.bf16.mxu0 %v1863_v0  ;;  %v902_v19 = vld [vmem:[#allocation8 + $0x18] sm:$0xff]  ;;  %v1388_v21 = vld [vmem:[%s2399_s5] ss:$0 sm:$0xff]  ;;  %v562_v37 = vunpack.c.l.s4 %v1870_v36  ;;  %s2206_s30 = sshll.u32 %s1847_s12, 9  ;;  %s423_s26 = scalar_lea.vmem [#allocation11], %s2194_s25 }
  0x92   : > { %v1474_v20 = vpack.c.bf16 %v902_v19, %v901_v18  ;;  %v1384_v23 = vld [vmem:[%s2398_s4] ss:$0 sm:$0xff]  ;;  %v531_v38 = vunpack.c.0.s8 %v530_v34  ;;  %s1172_s27 = sshll.u32 %s423_s26, 4  ;;  %s2434_s19 = sld [smem:[#allocation22_spill]]  ;;  %s2223_s27 = int_to_ptr.vmem [resolvable:$true] %s1172_s27 }
  0x93   : > { %1469 = vmatpush3.bf16.msra.mxu1 %v1468_v12  ;;  %v1392_v29 = vld [vmem:[%s2400_s6] ss:$0 sm:$0xff]  ;;  %v563_v42 = vunpack.c.0.s8 %v562_v37  ;;  %s2234_s16 = scalar_lea.vmem [#allocation10], %s2194_s25  ;;  %s1871_s9 = smov [#allocation11]  }
  0x94   : > { %1463 = vmatpush3.bf16.msra.mxu0 %v1462_v13  ;;  %v2175_v43 = vsub.s32 %v531_v38, %v533_v39  ;;  %s1709_s20 = sshll.u32 %s1871_s9, 4  ;;  %s1710_s20 = int_to_ptr.vmem [resolvable:$false] %s1709_s20 }
  0x95   : > { %1470 = vmatprep.subr.bf16.mxu0 %v1863_v0  ;;  %v2177_v50 = vsub.s32 %v563_v42, %v533_v39  ;;  %p1712_p0 = scmp.lt.s32.totalorder %s2223_s27, %s1710_s20 }
  0x96   : > { %1445 = vmatmul.mubr.msk.f32.vlgmr.msra.gmra.mrb[0].mxu1 %vm443_vm1, %v431_v16 }
  0x97   : > { %1434 = vmatmul.mubr.msk.f32.vlgmr.msra.gmra.mrb[0].mxu0 %vm443_vm1, %v431_v16 }
  0x98   : > { %1472 = vmatpush3.bf16.msra.mxu0 %v1471_v17  ;;  %1455 = vmatprep.mubr.msk.f32.mxu0 %vm1864_vm0, %v1865_v1  ;;  %s2221_s23 = scalar_lea.hbm %s2434_s19, %s2206_s30 }
  0x99   : > { %1473 = vmatprep.subr.bf16.mxu0 %v1863_v0 }
  0x9c   : > { %1475 = vmatpush3.bf16.msra.mxu0 %v1474_v20 }
  0x9f   : > { %1456 = vmatmul.mubr.msk.f32.vlgmr.msra.gmra.mrb[2].mxu0 %vm443_vm1, %v431_v16 }
 0x169   : > { %v745_v22 = vpop.f32.mrb[0].mxu1 }
 0x16a   : > { %v746_v24 = vadd.f32 %v1388_v21, %v745_v22  ;;  %v1446_v25 = vpop.f32.mrb[1].mxu1  ;;  %v513_v26 = vpop.f32.mrb[0].mxu0 }
 0x16b   : > { %v1435_v27 = vpop.f32.mrb[1].mxu0  ;;  %v514_v28 = vadd.f32 %v1384_v23, %v513_v26 }
 0x16c   : > { %756 = vrot.lane.b32.xlu1 %v746_v24, %s1866_s21  ;;  %750 = vrot.lane.b32.xlu0 %v746_v24, %s1867_s24 }
 0x170   : > { %753 = vrot.lane.b32.xlu0 %v746_v24, %s1868_s29  ;;  %518 = vrot.lane.b32.xlu1 %v514_v28, %s1867_s24 }
 0x172   : > { %v976_v30 = vpop.f32.mrb[2].mxu0 }
 0x173   : > { %v1457_v31 = vpop.f32.mrb[3].mxu0  ;;  %v2170_v32 = vadd.f32 %v1392_v29, %v976_v30 }
 0x174   : > { %521 = vrot.lane.b32.xlu0 %v514_v28, %s1868_s29  ;;  %524 = vrot.lane.b32.xlu1 %v514_v28, %s1866_s21 }
 0x178   : > { %984 = vrot.lane.b32.xlu1 %v2170_v32, %s1868_s29  ;;  %981 = vrot.lane.b32.xlu0 %v2170_v32, %s1867_s24  ;;  %s2243_s24 = scalar_lea.sflag [#allocation12], %s1135_s18  ;;  %s1705_s29 = scalar_lea.vmem %s2223_s27, 512 }
 0x179   : > { %p1706_p5 = scmp.ne.s32.totalorder %s2223_s27, %s1705_s29 }
 0x17b   : > { %p1707_p7 = pnand %p1706_p5, %p2084_p10 }
 0x17c   : > { %987 = vrot.lane.b32.xlu0 %v2170_v32, %s1866_s21  ;;  %s1155_s21 = sshll.u32 %s2234_s16, 4  ;;  %s2282_s21 = int_to_ptr.vmem [resolvable:$true] %s1155_s21 }
 0x17d   : > { %p1708_p9 = pneg %p1707_p7 }
 0x1de   : > { %v757_v40 = vpop.permute.xlu1 %756  ;;  %v751_v41 = vpop.permute.xlu0 %750 }
 0x1df   : > { %v775_v44 = vcombine.low %v751_v41, %v757_v40  ;;  %v776_v45 = vcombine.high %v751_v41, %v757_v40 }
 0x1e1   : > { %v783_v51 = vrot.slane %v775_v44, %v2175_v43  ;;  %v790_v52 = vrot.slane %v776_v45, %v2175_v43 }
 0x1e2   : > { %v754_v46 = vpop.permute.xlu0 %753  ;;  %v519_v47 = vpop.permute.xlu1 %518 }
 0x1e3   : > { %v759_v48 = vcombine.low %v746_v24, %v754_v46  ;;  %v760_v49 = vcombine.high %v746_v24, %v754_v46 }
 0x1e5   : > { %v767_v53 = vrot.slane %v759_v48, %v2175_v43  ;;  %v774_v54 = vrot.slane %v760_v49, %v2175_v43 }
 0x1e6   : > { %v522_v55 = vpop.permute.xlu0 %521  ;;  %v525_v56 = vpop.permute.xlu1 %524 }
 0x1e7   : > { %v791_v57 = vcombine.low %v767_v53, %v783_v51  ;;  %v792_v58 = vcombine.high %v767_v53, %v783_v51  ;;  %v807_v59 = vcombine.low %v774_v54, %v790_v52  ;;  %v808_v60 = vcombine.high %v774_v54, %v790_v52 }
 0x1e8   : > { %v527_v61 = vcombine.low %v514_v28, %v522_v55  ;;  %v528_v62 = vcombine.high %v514_v28, %v522_v55  ;;  %v543_v63 = vcombine.low %v519_v47, %v525_v56  ;;  %v544_v0 = vcombine.high %v519_v47, %v525_v56 }
 0x1e9   : > { %v799_v1 = vrot.slane %v791_v57, %v2177_v50  ;;  %v806_v2 = vrot.slane %v792_v58, %v2177_v50  ;;  %v815_v3 = vrot.slane %v807_v59, %v2177_v50  ;;  %v822_v4 = vrot.slane %v808_v60, %v2177_v50 }
 0x1ea   : > { %v535_v5 = vrot.slane %v527_v61, %v2175_v43  ;;  %v542_v6 = vrot.slane %v528_v62, %v2175_v43  ;;  %v551_v7 = vrot.slane %v543_v63, %v2175_v43  ;;  %v558_v8 = vrot.slane %v544_v0, %v2175_v43  ;;  %v2191_v17 = vpop.permute.xlu0 %981  ;;  %v985_v44 = vpop.permute.xlu1 %984 }
 0x1eb   : > { %v827_v9 = vcombine.low %v799_v1, %v806_v2  ;;  %v1390_v10 = vcombine.high %v799_v1, %v806_v2  ;;  %v843_v11 = vcombine.low %v815_v3, %v822_v4  ;;  %v1391_v12 = vcombine.high %v815_v3, %v822_v4 }
 0x1ec   : > { %v559_v13 = vcombine.low %v535_v5, %v551_v7  ;;  %v560_v14 = vcombine.high %v535_v5, %v551_v7  ;;  %v575_v15 = vcombine.low %v542_v6, %v558_v8  ;;  %v576_v16 = vcombine.high %v542_v6, %v558_v8 }
 0x1ed   : > { %v834_v18 = vrot.slane %v827_v9, %v2175_v43  ;;  %v842_v19 = vrot.slane %v1390_v10, %v2175_v43  ;;  %v850_v20 = vrot.slane %v843_v11, %v2175_v43  ;;  %v858_v21 = vrot.slane %v1391_v12, %v2175_v43 }
 0x1ee   : > { %v567_v22 = vrot.slane %v559_v13, %v2177_v50  ;;  %v574_v23 = vrot.slane %v560_v14, %v2177_v50  ;;  %v583_v24 = vrot.slane %v575_v15, %v2177_v50  ;;  %v590_v25 = vrot.slane %v576_v16, %v2177_v50  ;;  %v988_v45 = vpop.permute.xlu0 %987 }
 0x1ef   : > { %v859_v26 = vcombine.low %v834_v18, %v842_v19  ;;  %v860_v27 = vcombine.high %v834_v18, %v842_v19  ;;  %v875_v28 = vcombine.low %v850_v20, %v858_v21  ;;  %v876_v29 = vcombine.high %v850_v20, %v858_v21 }
 0x1f0   : > { %v595_v30 = vcombine.low %v567_v22, %v574_v23  ;;  %v1386_v31 = vcombine.high %v567_v22, %v574_v23  ;;  %v611_v33 = vcombine.low %v583_v24, %v590_v25  ;;  %v1387_v34 = vcombine.high %v583_v24, %v590_v25 }
 0x1f1   : > { %v867_v35 = vrot.slane %v859_v26, %v2177_v50  ;;  %v874_v36 = vrot.slane %v860_v27, %v2177_v50  ;;  %v883_v37 = vrot.slane %v875_v28, %v2177_v50  ;;  %v890_v38 = vrot.slane %v876_v29, %v2177_v50 }
 0x1f2   : > { %v602_v39 = vrot.slane %v595_v30, %v2175_v43  ;;  %v610_v40 = vrot.slane %v1386_v31, %v2175_v43  ;;  %v618_v41 = vrot.slane %v611_v33, %v2175_v43  ;;  %v626_v42 = vrot.slane %v1387_v34, %v2175_v43 }
 0x1f3   : > { %v891_v46 = vcombine.low %v867_v35, %v883_v37  ;;  %v892_v47 = vcombine.high %v867_v35, %v883_v37  ;;  %v893_v48 = vcombine.low %v874_v36, %v890_v38  ;;  %v894_v49 = vcombine.high %v874_v36, %v890_v38 }
 0x1f4   : > { %v627_v51 = vcombine.low %v602_v39, %v610_v40  ;;  %v628_v52 = vcombine.high %v602_v39, %v610_v40  ;;  %v643_v53 = vcombine.low %v618_v41, %v626_v42  ;;  %v644_v54 = vcombine.high %v618_v41, %v626_v42 }
 0x1f5   : > { %v990_v55 = vcombine.low %v2170_v32, %v985_v44  ;;  %v991_v56 = vcombine.high %v2170_v32, %v985_v44  ;;  %v1006_v57 = vcombine.low %v2191_v17, %v988_v45  ;;  %v1007_v58 = vcombine.high %v2191_v17, %v988_v45  ;;  %895 = vst.msk [vmem:[%s423_s26] sm:$0xff] %vm663_vm2, %v891_v46 }
 0x1f6   : > { %896 = vst.msk [vmem:[%s423_s26 + $0x8] sm:$0xff] %vm663_vm2, %v892_v47  ;;  %897 = vst.msk [vmem:[%s423_s26 + $0x10] sm:$0xff] %vm663_vm2, %v893_v48  ;;  %v635_v32 = vrot.slane %v627_v51, %v2177_v50  ;;  %v642_v59 = vrot.slane %v628_v52, %v2177_v50  ;;  %v651_v60 = vrot.slane %v643_v53, %v2177_v50 }
 0x1f7   : > { %898 = vst.msk [vmem:[%s423_s26 + $0x18] sm:$0xff] %vm663_vm2, %v894_v49  ;;  %v658_v61 = vrot.slane %v644_v54, %v2177_v50  ;;  %s1711_s26 = scalar_lea.vmem %s1710_s20, 1024 }
 0x1f8   : > { %p1713_p2 = scmp.lt.s32.totalorder %s1711_s26, %s1705_s29 }
 0x1fa   : > { %p1714_p4 = por %p1713_p2, %p1712_p0 }
 0x1fc   : > { %p1715_p8 = pnand %p1714_p4, %p1708_p9 }
 0x1fe   : > { %1718 = shalt.err (!%p1715_p8)
}
 0x1ff   : > { %s1719_s15 = scalar_lea.hbm %s2221_s23, 512  ;;  %s1723_s17 = scalar_lea.hbm %s2434_s19, 1024 }
 0x200   : > { %p1720_p1 = scmp.ne.s32.totalorder %s2221_s23, %s1719_s15  ;;  %p1724_p13 = scmp.lt.u32.totalorder %s2221_s23, %s2434_s19 }
 0x201   : > { %p1725_p6 = scmp.lt.u32.totalorder %s1723_s17, %s1719_s15  ;;  %p1727_p5 = scmp.lt.u32.totalorder %s1719_s15, %s2221_s23 }
 0x202   : > { %p1721_p12 = pnand %p1720_p1, %p2084_p10 }
 0x203   : > { %p1726_p3 = por %p1725_p6, %p1724_p13 }
 0x204   : > { %p1722_p11 = pneg %p1721_p12 }
 0x205   : > { %p1728_p7 = por %p1727_p5, %p1726_p3 }
 0x207   : > { %p1729_p9 = pnand %p1728_p7, %p1722_p11 }
 0x209   : > { %1732 = shalt.err (!%p1729_p9)
}
 0x20a   : > { %s2413_s29 = smov 128   ;;  %s1873_s26 = smov 8   ;;  %v998_v62 = vrot.slane %v990_v55, %v2175_v43  ;;  %v1005_v63 = vrot.slane %v991_v56, %v2175_v43  ;;  %v1014_v0 = vrot.slane %v1006_v57, %v2175_v43  ;;  %v1021_v1 = vrot.slane %v1007_v58, %v2175_v43 }
 0x20b   : > { %1491 = dma.vmem_to_hbm [thread:$0]  (%p2084_p10), %s2223_s27, 512, %s2221_s23, %s2243_s24, %s2413_s29, %s2413_s29, %s1873_s26   ;;  %v659_v2 = vcombine.low %v635_v32, %v651_v60  ;;  %v660_v3 = vcombine.high %v635_v32, %v651_v60  ;;  %v661_v4 = vcombine.low %v642_v59, %v658_v61  ;;  %v662_v5 = vcombine.high %v642_v59, %v658_v61 }
 0x20c   : > { %s2435_s12 = sld [smem:[#allocation21_spill]]  ;;  %v1022_v6 = vcombine.low %v998_v62, %v1014_v0  ;;  %v1023_v7 = vcombine.high %v998_v62, %v1014_v0  ;;  %v1038_v8 = vcombine.low %v1005_v63, %v1021_v1  ;;  %v1039_v9 = vcombine.high %v1005_v63, %v1021_v1  ;;  %s1733_s9 = scalar_lea.vmem %s2282_s21, 512 }
 0x20d   : > { %664 = vst.msk [vmem:[%s2234_s16] sm:$0xff] %vm663_vm2, %v659_v2  ;;  %665 = vst.msk [vmem:[%s2234_s16 + $0x8] sm:$0xff] %vm663_vm2, %v660_v3  ;;  %p1734_p0 = scmp.ne.s32.totalorder %s2282_s21, %s1733_s9  ;;  %s1874_s20 = smov [#allocation10]  }
 0x20e   : > { %666 = vst.msk [vmem:[%s2234_s16 + $0x10] sm:$0xff] %vm663_vm2, %v661_v4  ;;  %667 = vst.msk [vmem:[%s2234_s16 + $0x18] sm:$0xff] %vm663_vm2, %v662_v5  ;;  %v1030_v10 = vrot.slane %v1022_v6, %v2177_v50  ;;  %v1037_v11 = vrot.slane %v1023_v7, %v2177_v50  ;;  %v1046_v12 = vrot.slane %v1038_v8, %v2177_v50  ;;  %s1737_s15 = sshll.u32 %s1874_s20, 4  ;;  %s1738_s15 = int_to_ptr.vmem [resolvable:$false] %s1737_s15 }
 0x20f   : > { %v1053_v13 = vrot.slane %v1039_v9, %v2177_v50  ;;  %p1735_p2 = pnand %p1734_p0, %p2084_p10  ;;  %s1739_s18 = scalar_lea.vmem %s1738_s15, 1024 }
 0x210   : > { %p1740_p8 = scmp.lt.s32.totalorder %s2282_s21, %s1738_s15  ;;  %p1741_p1 = scmp.lt.s32.totalorder %s1739_s18, %s1733_s9 }
 0x211   : > { %p1736_p4 = pneg %p1735_p2 }
 0x212   : > { %s2436_s17 = smov %s2435_s12  ;;  %s2278_s27 = scalar_lea.hbm %s2435_s12, %s2206_s30 }
 0x213   : > { %p1742_p12 = por %p1741_p1, %p1740_p8 }
 0x215   : > { %p1743_p11 = pnand %p1742_p12, %p1736_p4 }
 0x217   : > { %1746 = shalt.err (!%p1743_p11)
}
 0x218   : > { %s1747_s16 = scalar_lea.hbm %s2278_s27, 512  ;;  %s1751_s20 = scalar_lea.hbm %s2436_s17, 1024 }
 0x219   : > { %p1748_p13 = scmp.ne.s32.totalorder %s2278_s27, %s1747_s16  ;;  %p1752_p5 = scmp.lt.u32.totalorder %s2278_s27, %s2436_s17 }
 0x21a   : > { %p1753_p7 = scmp.lt.u32.totalorder %s1751_s20, %s1747_s16  ;;  %p1755_p0 = scmp.lt.u32.totalorder %s1747_s16, %s2278_s27 }
 0x21b   : > { %p1749_p6 = pnand %p1748_p13, %p2084_p10 }
 0x21c   : > { %p1754_p9 = por %p1753_p7, %p1752_p5 }
 0x21d   : > { %p1750_p3 = pneg %p1749_p6 }
 0x21e   : > { %p1756_p2 = por %p1755_p0, %p1754_p9 }
 0x220   : > { %p1757_p4 = pnand %p1756_p2, %p1750_p3 }
 0x222   : > { %1760 = shalt.err (!%p1757_p4)
}
 0x223   : > { %s2437_s9 = smov 128   ;;  %s2438_s18 = scalar_lea.sflag [#allocation4], %s2139_s7  ;;  %v1058_v14 = vcombine.low %v1030_v10, %v1037_v11  ;;  %v1394_v15 = vcombine.high %v1030_v10, %v1037_v11  ;;  %v1074_v16 = vcombine.low %v1046_v12, %v1053_v13  ;;  %v1395_v17 = vcombine.high %v1046_v12, %v1053_v13 }
 0x224   : > { %1490 = dma.vmem_to_hbm [thread:$0]  (%p2084_p10), %s2282_s21, 512, %s2278_s27, %s2438_s18, %s2437_s9, %s2437_s9, %s1873_s26  }
 0x225   : > { %v1065_v18 = vrot.slane %v1058_v14, %v2175_v43  ;;  %v1073_v19 = vrot.slane %v1394_v15, %v2175_v43  ;;  %v1081_v20 = vrot.slane %v1074_v16, %v2175_v43  ;;  %v1089_v21 = vrot.slane %v1395_v17, %v2175_v43  ;;  %s430_s7 = scalar_lea.vmem [#allocation13], %s2194_s25  ;;  %s2439_s23 = sld [smem:[#allocation23_spill]] }
 0x226   : > { %s1189_s29 = sshll.u32 %s430_s7, 4  ;;  %s2338_s29 = int_to_ptr.vmem [resolvable:$true] %s1189_s29 }
 0x227   : > { %v1090_v22 = vcombine.low %v1065_v18, %v1073_v19  ;;  %v1091_v23 = vcombine.high %v1065_v18, %v1073_v19  ;;  %v1106_v24 = vcombine.low %v1081_v20, %v1089_v21  ;;  %v1107_v25 = vcombine.high %v1081_v20, %v1089_v21  ;;  %s1761_s25 = scalar_lea.vmem %s2338_s29, 512 }
 0x228   : > { %p1762_p8 = scmp.ne.s32.totalorder %s2338_s29, %s1761_s25 }
 0x229   : > { %v1098_v26 = vrot.slane %v1090_v22, %v2177_v50  ;;  %v1105_v27 = vrot.slane %v1091_v23, %v2177_v50  ;;  %v1114_v28 = vrot.slane %v1106_v24, %v2177_v50  ;;  %v1121_v29 = vrot.slane %v1107_v25, %v2177_v50 }
 0x22a   : > { %p1763_p1 = pnand %p1762_p8, %p2084_p10 }
 0x22b   : > { %v1122_v30 = vcombine.low %v1098_v26, %v1114_v28  ;;  %v1123_v31 = vcombine.high %v1098_v26, %v1114_v28  ;;  %v1124_v33 = vcombine.low %v1105_v27, %v1121_v29  ;;  %v1125_v34 = vcombine.high %v1105_v27, %v1121_v29  ;;  %s2336_s16 = scalar_lea.hbm %s2439_s23, %s2206_s30  ;;  %s1875_s30 = smov [#allocation13]  }
 0x22c   : > { %p1764_p12 = pneg %p1763_p1  ;;  %s1765_s12 = sshll.u32 %s1875_s30, 4  ;;  %s1766_s12 = int_to_ptr.vmem [resolvable:$false] %s1765_s12 }
 0x22d   : > { %1126 = vst.msk [vmem:[%s430_s7] sm:$0xff] %vm663_vm2, %v1122_v30  ;;  %1127 = vst.msk [vmem:[%s430_s7 + $0x8] sm:$0xff] %vm663_vm2, %v1123_v31  ;;  %s1767_s20 = scalar_lea.vmem %s1766_s12, 1024  ;;  %p1768_p11 = scmp.lt.s32.totalorder %s2338_s29, %s1766_s12 }
 0x22e   : > { %1128 = vst.msk [vmem:[%s430_s7 + $0x10] sm:$0xff] %vm663_vm2, %v1124_v33  ;;  %1129 = vst.msk [vmem:[%s430_s7 + $0x18] sm:$0xff] %vm663_vm2, %v1125_v34  ;;  %p1769_p13 = scmp.lt.s32.totalorder %s1767_s20, %s1761_s25 }
 0x230   : > { %p1770_p6 = por %p1769_p13, %p1768_p11 }
 0x232   : > { %p1771_p3 = pnand %p1770_p6, %p1764_p12 }
 0x234   : > { %1774 = shalt.err (!%p1771_p3)
}
 0x235   : > { %s1775_s15 = scalar_lea.hbm %s2336_s16, 512  ;;  %s1779_s21 = scalar_lea.hbm %s2439_s23, 1024 }
 0x236   : > { %p1776_p5 = scmp.ne.s32.totalorder %s2336_s16, %s1775_s15  ;;  %p1780_p0 = scmp.lt.u32.totalorder %s2336_s16, %s2439_s23 }
 0x237   : > { %p1781_p2 = scmp.lt.u32.totalorder %s1779_s21, %s1775_s15  ;;  %p1783_p8 = scmp.lt.u32.totalorder %s1775_s15, %s2336_s16 }
 0x238   : > { %p1777_p7 = pnand %p1776_p5, %p2084_p10 }
 0x239   : > { %p1782_p4 = por %p1781_p2, %p1780_p0 }
 0x23a   : > { %p1778_p9 = pneg %p1777_p7 }
 0x23b   : > { %p1784_p1 = por %p1783_p8, %p1782_p4 }
 0x23d   : > { %p1785_p12 = pnand %p1784_p1, %p1778_p9 }
 0x23f   : > { %1788 = shalt.err (!%p1785_p12)
}
 0x240   : > { %1492 = dma.vmem_to_hbm [thread:$0]  (%p2084_p10), %s2338_s29, 512, %s2336_s16, %s2243_s24, %s2437_s9, %s2437_s9, %s1873_s26  }
 0x241 PF: > { %s2440_s25 = sld [smem:[#allocation19_spill]]  ;;  %s2441_s12 = sld [smem:[#allocation20_spill]] }
 0x242   : > { %p2443_p13 = scmp.ge.s32.totalorder %s1855_s14, 2 }
 0x247   : > { %s1204_s20 = sand.u32 1, %s2440_s25   ;;  %p2442_p11 = scmp.ne.s32.totalorder %s2441_s12, 0 }
 0x248   : > { %s1205_s15 = scalar_lea.sflag [#allocation4], %s1204_s20 }
 0x249   : > { %p1511_p6 = pnand %p2443_p13, %p2442_p11 }
 0x24b   : > { %1826 = dma.done.wait (!%p1511_p6), %s1205_s15, 512  }
 0x24c   : > { %1828 = vsyncadd (!%p1511_p6), %s1205_s15, 4294966784  ;;  %s2444_s8 = sadd.s32 4294967294, %s1855_s14  }
 0x24d   : > { %s1213_s18 = sand.u32 1, %s2444_s8  }
 0x24e   : > { %s1214_s7 = scalar_lea.sflag [#allocation12], %s1213_s18 }
 0x24f   : > { %1830 = dma.done.wait (!%p1511_p6), %s1214_s7, 1024  }
 0x250   : > { %1832 = vsyncadd (!%p1511_p6), %s1214_s7, 4294966272  ;;  %s31_s14 = sadd.s32 1, %s1855_s14   ;;  %s2445_s30 = smov %s1839_s10 }
 0x251   : > { %p28_p10 = scmp.ge.s32.totalorder %s31_s14, 4   ;;  %s2446_s10 = smov %s1843_s11 }
 0x252   : > { %s2447_s11 = smov %s2096_s28  ;;  %s2448_s12 = smov %s1851_s13 }
 0x253   : > { %s2449_s13 = smov %s2451_s22  ;;  %30 = sbr.rel (!%p28_p10) target bundleno = 14 (0xe), region = 137 }
 0x25a   :  { %1228 = vsyncpa [#allocation3], 1 }
 0x25b   :  { %1230 = vsyncpa [#allocation3 + $0x1], 1 }
 0x25c   :  { %1231 = vsyncpa [#allocation6], 1 }
 0x25d   :  { %1232 = vsyncpa [#allocation9], 1 }
 0x25e   :  { %1233 = vsyncpa [#allocation4], 1 }
 0x25f   :  { %1235 = vsyncpa [#allocation4 + $0x1], 1 }
 0x260   :  { %1236 = vsyncpa [#allocation12], 1 }
 0x261   :  { %1238 = vsyncpa [#allocation12 + $0x1], 1 }

</bundles_post_ra>
